<compile_context>
chip_gen: v7x
topology: tpu7x:2x2x1
jax: 0.10.0
libtpu: 0.0.40
codegen_flags: <defaults>
</compile_context>

<pallas_src>
import numpy as np
import jax
import jax.numpy as jnp
from jax.experimental import pallas as pl
from jax.experimental.pallas import tpu as pltpu

# ----- module hyper-parameters (small, consistent with the PyTorch module) -----
NUM_NODES = 8      # nodes per type ('s' and 't') -> x has 2*NUM_NODES rows
NODE_IN   = 8      # node_input_dim
EDGE_IN   = 4      # edge_input_dim
NODE_DIM  = 16     # node_dim (conv out channels)
EDGE_DIM  = 8      # edge_dim
LAYERS    = 2      # gnn_layer_num
NUM_EDGES = 32     # bipartite edges (half s->t, half t->s)


def _vmem():
    return pl.BlockSpec(memory_space=pltpu.MemorySpace.VMEM)


# -------------------- host-side slab packing --------------------

def _pack_slab(blocks, width, align=8, dtype=jnp.bfloat16):
    """Pack 2-D blocks into one (rows, width) slab; every block starts on a sublane-aligned
    row.  Returns (slab, offsets) with offsets[i] = (row_start, row_stop, cols)."""
    padded, offs, r = [], [], 0
    for b in blocks:
        b = jnp.asarray(b, jnp.float32)
        rows, cols = int(b.shape[0]), int(b.shape[1])
        prows = -(-rows // align) * align
        padded.append(jnp.pad(b, ((0, prows - rows), (0, width - cols))))
        offs.append((r, r + rows, cols))
        r += prows
    return jnp.concatenate(padded, axis=0).astype(dtype), offs


def build_graph_slab(edge_index, num_nodes):
    # edge_index_extraction stays on the host: boolean masks give data-dependent shapes
    # (same limitation as in PyTorch); indices are static for a given graph.
    src = np.asarray(edge_index)[0].astype(np.int64)
    dst = np.asarray(edge_index)[1].astype(np.int64)
    E = int(src.shape[0])
    nt = np.nonzero((src < num_nodes) & (dst >= num_nodes))[0]     # ('s','s2t','t')
    tn = np.nonzero((src >= num_nodes) & (dst < num_nodes))[0]     # ('t','t2s','s')
    rest = np.setdiff1d(np.arange(E), np.concatenate([nt, tn]))
    perm = np.concatenate([nt, tn, rest])          # nt block first -> static ea slices in-kernel
    E_nt, E_tn = int(len(nt)), int(len(tn))

    nt_src, nt_dst = src[nt], dst[nt] - num_nodes  # module's index remapping
    tn_src, tn_dst = src[tn] - num_nodes, dst[tn]

    def onehot(idx, ncols):
        m = np.zeros((len(idx), ncols), np.float32)
        m[np.arange(len(idx)), idx] = 1.0
        return m

    G_nt = onehot(nt_src, num_nodes)               # gather x_j from the 's' half
    G_tn = onehot(tn_src, num_nodes)               # remapped src -> also gathers from the 's' half
    # scatter-add matrices restricted to the node rows the module keeps
    S_t = np.zeros((num_nodes, max(E_nt, 1)), np.float32)[:, :E_nt]  # kept 't' rows [N:2N)
    for e, d in enumerate(nt_dst):
        if num_nodes <= d < 2 * num_nodes:         # never true after the module's dst-N remap
            S_t[d - num_nodes, e] = 1.0
    S_s = np.zeros((num_nodes, max(E_tn, 1)), np.float32)[:, :E_tn]  # kept 's' rows [0:N)
    for e, d in enumerate(tn_dst):
        if 0 <= d < num_nodes:
            S_s[d, e] = 1.0
    # merged gathers for the edge update, in permuted edge order
    G_src = onehot(src[perm], 2 * num_nodes)       # x_i = x[edge_index[0]]
    G_dst = onehot(dst[perm], 2 * num_nodes)       # x_j = x[edge_index[1]]

    width = max(2 * num_nodes, E_nt, E_tn, 1)
    slab, offs = _pack_slab([G_nt, G_tn, S_t, S_s, G_src, G_dst], width)
    layout = dict(zip(["G_nt", "G_tn", "S_t", "S_s", "G_src", "G_dst"], offs))
    return slab, layout, perm, E_nt, E_tn


def pack_param_slabs(params):
    node_blocks, node_keys, edge_blocks, edge_keys = [], [], [], []
    for l in range(LAYERS):
        W_mt, b_mt, W_ms, b_ms, W_at, b_at, W_as, b_as = params["convs"][l]
        for name, arr in (("W_mt", W_mt), ("b_mt", b_mt), ("W_ms", W_ms), ("b_ms", b_ms),
                          ("W_at", W_at), ("b_at", b_at), ("W_as", W_as), ("b_as", b_as)):
            node_keys.append((l, name)); node_blocks.append(arr)
        W_e, b_e = params["edge_mlps"][l]
        edge_keys.append((l, "W_e")); edge_blocks.append(W_e)
        edge_keys.append((l, "b_e")); edge_blocks.append(b_e)
    nw_slab, n_offs = _pack_slab(node_blocks, NODE_DIM)
    ew_slab, e_offs = _pack_slab(edge_blocks, EDGE_DIM)
    return nw_slab, ew_slab, dict(zip(node_keys, n_offs)), dict(zip(edge_keys, e_offs))


# -------------------- fused forward: one pallas_call --------------------

def gnn_stack_forward(x, edge_attr, edge_index, params, num_nodes):
    N = num_nodes
    g_slab, g_layout, perm, E_nt, E_tn = build_graph_slab(edge_index, N)
    nw_slab, ew_slab, nw_layout, ew_layout = pack_param_slabs(params)

    x_in = x.astype(jnp.bfloat16)
    ea_in = jnp.take(edge_attr, jnp.asarray(perm.astype(np.int32)), axis=0).astype(jnp.bfloat16)

    def take(ref, off):                 # static, sublane-aligned slab slice (free)
        r0, r1, c = off
        return ref[r0:r1, 0:c]

    def kernel(x_ref, ea_ref, g_ref, nw_ref, ew_ref, out_ref):
        bf16, f32 = jnp.bfloat16, jnp.float32

        def mm(a, b):                   # MXU: bf16 inputs, f32 accumulation
            return jnp.dot(a.astype(bf16), b.astype(bf16), preferred_element_type=f32)

        def relu(v):
            return jnp.maximum(v, 0.0)

        def l2norm(h):                  # F.normalize(p=2, eps=1e-12) via EUP rsqrt
            ss = jnp.sum(h * h, axis=-1, keepdims=True)
            return h * jax.lax.rsqrt(jnp.maximum(ss, 1e-24))

        G_nt  = take(g_ref, g_layout["G_nt"])
        G_tn  = take(g_ref, g_layout["G_tn"])
        S_t   = take(g_ref, g_layout["S_t"])
        S_s   = take(g_ref, g_layout["S_s"])
        G_src = take(g_ref, g_layout["G_src"])
        G_dst = take(g_ref, g_layout["G_dst"])

        x_full = x_ref[...].astype(f32)     # [2N, NODE_IN]
        ea = ea_ref[...].astype(f32)        # [E, EDGE_IN], rows ordered (nt block, tn block, rest)

        outs = []
        for l in range(LAYERS):             # statically unrolled: all weights stay VMEM-resident
            W_mt = take(nw_ref, nw_layout[(l, "W_mt")]); b_mt = take(nw_ref, nw_layout[(l, "b_mt")]).astype(f32)
            W_ms = take(nw_ref, nw_layout[(l, "W_ms")]); b_ms = take(nw_ref, nw_layout[(l, "b_ms")]).astype(f32)
            W_at = take(nw_ref, nw_layout[(l, "W_at")]); b_at = take(nw_ref, nw_layout[(l, "b_at")]).astype(f32)
            W_as = take(nw_ref, nw_layout[(l, "W_as")]); b_as = take(nw_ref, nw_layout[(l, "b_as")]).astype(f32)

            xs = x_full[0:N, :]
            xt = x_full[N:2 * N, :]

            # ---- ('s','s2t','t') propagation; only rows [N:2N) of the update are kept ----
            xj_t = mm(G_nt, xs)
            msg_t = relu(mm(jnp.concatenate([xj_t, ea[0:E_nt, :]], axis=-1), W_mt) + b_mt)
            aggr_t = mm(S_t, msg_t)     # identically zero (module's dst-remap quirk); kept for faithfulness
            xt_new = l2norm(relu(mm(jnp.concatenate([aggr_t, xt], axis=-1), W_at) + b_at))

            # ---- ('t','t2s','s') propagation; only rows [0:N) of the update are kept ----
            xj_s = mm(G_tn, xs)         # module remaps src-N, so x_j comes from the 's' half
            msg_s = relu(mm(jnp.concatenate([xj_s, ea[E_nt:E_nt + E_tn, :]], axis=-1), W_ms) + b_ms)
            aggr_s = mm(S_s, msg_s)
            xs_new = l2norm(relu(mm(jnp.concatenate([aggr_s, xs], axis=-1), W_as) + b_as))

            x_full = jnp.concatenate([xs_new, xt_new], axis=0)   # [2N, NODE_DIM]
            outs.append(x_full)

            # ---- edge-attribute update feeding the next layer (skipped after the last conv) ----
            if l + 1 < LAYERS:
                W_e = take(ew_ref, ew_layout[(l, "W_e")])
                b_e = take(ew_ref, ew_layout[(l, "b_e")]).astype(f32)
                x_i = mm(G_src, x_full)
                x_j = mm(G_dst, x_full)
                ea = relu(mm(jnp.concatenate([x_i, x_j, ea], axis=-1), W_e) + b_e)

        out_ref[...] = jnp.concatenate(outs, axis=-1)   # single store of concat_x [2N, LAYERS*NODE_DIM]

    return pl.pallas_call(
        kernel,
        out_shape=jax.ShapeDtypeStruct((2 * N, LAYERS * NODE_DIM), jnp.float32),
        in_specs=[_vmem()] * 5,
        out_specs=_vmem(),
    )(x_in, ea_in, g_slab, nw_slab, ew_slab)


# -------------------- pure-JAX reference (module semantics, f32 HIGHEST) --------------------

def gnn_stack_forward_ref(x, edge_attr, edge_index, params, num_nodes):
    def mm(a, b):
        return jnp.dot(a, b, precision=jax.lax.Precision.HIGHEST)

    def relu(v):
        return jnp.maximum(v, 0.0)

    def node_update(aggr, xx, W, b):
        h = relu(mm(jnp.concatenate([aggr, xx], axis=-1), W) + b)
        n = jnp.sqrt(jnp.sum(h * h, axis=-1, keepdims=True))
        return h / jnp.maximum(n, 1e-12)                 # F.normalize(p=2, eps=1e-12)

    src = np.asarray(edge_index)[0]
    dst = np.asarray(edge_index)[1]
    n_total = int(x.shape[0])
    nt = np.nonzero((src < num_nodes) & (dst >= num_nodes))[0]
    tn = np.nonzero((src >= num_nodes) & (dst < num_nodes))[0]
    nt_src, nt_dst = src[nt], dst[nt] - num_nodes
    tn_src, tn_dst = src[tn] - num_nodes, dst[tn]

    concat_x = []
    for l in range(LAYERS):
        W_mt, b_mt, W_ms, b_ms, W_at, b_at, W_as, b_as = params["convs"][l]
        m_t = relu(mm(jnp.concatenate([x[nt_src], edge_attr[nt]], axis=-1), W_mt) + b_mt)
        aggr_t = jax.ops.segment_sum(m_t, jnp.asarray(nt_dst, jnp.int32), num_segments=n_total)
        xt = node_update(aggr_t, x, W_at, b_at)
        m_s = relu(mm(jnp.concatenate([x[tn_src], edge_attr[tn]], axis=-1), W_ms) + b_ms)
        aggr_s = jax.ops.segment_sum(m_s, jnp.asarray(tn_dst, jnp.int32), num_segments=n_total)
        xs = node_update(aggr_s, x, W_as, b_as)
        x = jnp.concatenate([xs[:num_nodes], xt[num_nodes:]], axis=0)
        concat_x.append(x)
        W_e, b_e = params["edge_mlps"][l]
        edge_attr = relu(mm(jnp.concatenate([x[src], x[dst], edge_attr], axis=-1), W_e) + b_e)
    return jnp.concatenate(concat_x, axis=1)


# -------------------- deterministic parameter init (fused-linear layout) --------------------

def init_params(key):
    def w(k, shape):
        return jax.random.normal(k, shape, jnp.float32) * 0.1

    params = {"convs": [], "edge_mlps": []}
    for l in range(LAYERS):
        in_c = NODE_IN if l == 0 else NODE_DIM
        e_c = EDGE_IN if l == 0 else EDGE_DIM
        key, *ks = jax.random.split(key, 9)
        conv = (
            w(ks[0], (in_c + e_c, NODE_DIM)),      w(ks[1], (1, NODE_DIM)),   # message_lin 't' (rows: [x_j; ea])
            w(ks[2], (in_c + e_c, NODE_DIM)),      w(ks[3], (1, NODE_DIM)),   # message_lin 's'
            w(ks[4], (NODE_DIM + in_c, NODE_DIM)), w(ks[5], (1, NODE_DIM)),   # agg_lin 't'     (rows: [aggr; x])
            w(ks[6], (NODE_DIM + in_c, NODE_DIM)), w(ks[7], (1, NODE_DIM)),   # agg_lin 's'
        )
        params["convs"].append(conv)
        key, k1, k2 = jax.random.split(key, 3)
        # edge_update_mlp: Linear(2*node_dim + e_c, edge_dim)  (rows: [x_i; x_j; ea])
        params["edge_mlps"].append((w(k1, (2 * NODE_DIM + e_c, EDGE_DIM)), w(k2, (1, EDGE_DIM))))
    return params


if __name__ == "__main__":
    key = jax.random.PRNGKey(0)
    kx, ke, ks1, kd1, ks2, kd2, kp = jax.random.split(key, 7)

    x = jax.random.normal(kx, (2 * NUM_NODES, NODE_IN), jnp.float32)
    edge_attr = jax.random.normal(ke, (NUM_EDGES, EDGE_IN), jnp.float32)

    half = NUM_EDGES // 2
    src_st = np.asarray(jax.random.randint(ks1, (half,), 0, NUM_NODES))
    dst_st = np.asarray(jax.random.randint(kd1, (half,), NUM_NODES, 2 * NUM_NODES))
    src_ts = np.asarray(jax.random.randint(ks2, (half,), NUM_NODES, 2 * NUM_NODES))
    dst_ts = np.asarray(jax.random.randint(kd2, (half,), 0, NUM_NODES))
    edge_index = np.stack([np.concatenate([src_st, src_ts]),
                           np.concatenate([dst_st, dst_ts])]).astype(np.int32)

    params = init_params(kp)

    out = jax.block_until_ready(gnn_stack_forward(x, edge_attr, edge_index, params, NUM_NODES))
    ref = jax.block_until_ready(gnn_stack_forward_ref(x, edge_attr, edge_index, params, NUM_NODES))

    assert out.shape == (2 * NUM_NODES, LAYERS * NODE_DIM)
    # bf16 matmul inputs (f32 accumulation) vs. f32 HIGHEST reference -> relaxed tolerance
    np.testing.assert_allclose(np.asarray(out), np.asarray(ref), rtol=3e-2, atol=3e-2)
    print("KERNEL_OK")
</pallas_src>

<mosaic_0001>
module attributes {stable_mosaic.version = 11 : i64} {
  func.func @kernel(%arg0: memref<16x8xbf16, #tpu.memory_space<vmem>>, %arg1: memref<32x4xbf16, #tpu.memory_space<vmem>>, %arg2: memref<112x16xbf16, #tpu.memory_space<vmem>>, %arg3: memref<256x16xbf16, #tpu.memory_space<vmem>>, %arg4: memref<96x8xbf16, #tpu.memory_space<vmem>>, %arg5: memref<16x32xf32, #tpu.memory_space<vmem>>) attributes {dimension_semantics = [], scalar_prefetch = 0 : i64, scratch_operands = 0 : i64, tpu.core_type = #tpu.core_type<tc>} {
    %c0 = arith.constant 0 : index
    %c0_0 = arith.constant 0 : index
    %0 = vector.load %arg2[%c0, %c0_0] : memref<112x16xbf16, #tpu.memory_space<vmem>>, vector<16x8xbf16>
    %c16 = arith.constant 16 : index
    %c0_1 = arith.constant 0 : index
    %1 = vector.load %arg2[%c16, %c0_1] : memref<112x16xbf16, #tpu.memory_space<vmem>>, vector<16x8xbf16>
    %c32 = arith.constant 32 : index
    %c0_2 = arith.constant 0 : index
    %2 = vector.load %arg2[%c32, %c0_2] : memref<112x16xbf16, #tpu.memory_space<vmem>>, vector<8x16xbf16>
    %c40 = arith.constant 40 : index
    %c0_3 = arith.constant 0 : index
    %3 = vector.load %arg2[%c40, %c0_3] : memref<112x16xbf16, #tpu.memory_space<vmem>>, vector<8x16xbf16>
    %c48 = arith.constant 48 : index
    %c0_4 = arith.constant 0 : index
    %4 = vector.load %arg2[%c48, %c0_4] : memref<112x16xbf16, #tpu.memory_space<vmem>>, vector<32x16xbf16>
    %c80 = arith.constant 80 : index
    %c0_5 = arith.constant 0 : index
    %5 = vector.load %arg2[%c80, %c0_5] : memref<112x16xbf16, #tpu.memory_space<vmem>>, vector<32x16xbf16>
    %c0_6 = arith.constant 0 : index
    %c0_7 = arith.constant 0 : index
    %6 = vector.load %arg0[%c0_6, %c0_7] : memref<16x8xbf16, #tpu.memory_space<vmem>>, vector<16x8xbf16>
    %7 = arith.extf %6 : vector<16x8xbf16> to vector<16x8xf32>
    %c0_8 = arith.constant 0 : index
    %c0_9 = arith.constant 0 : index
    %8 = vector.load %arg1[%c0_8, %c0_9] : memref<32x4xbf16, #tpu.memory_space<vmem>>, vector<32x4xbf16>
    %9 = arith.extf %8 : vector<32x4xbf16> to vector<32x4xf32>
    %c0_10 = arith.constant 0 : index
    %c0_11 = arith.constant 0 : index
    %10 = vector.load %arg3[%c0_10, %c0_11] : memref<256x16xbf16, #tpu.memory_space<vmem>>, vector<12x16xbf16>
    %c16_12 = arith.constant 16 : index
    %c0_13 = arith.constant 0 : index
    %11 = vector.load %arg3[%c16_12, %c0_13] : memref<256x16xbf16, #tpu.memory_space<vmem>>, vector<1x16xbf16>
    %12 = arith.extf %11 : vector<1x16xbf16> to vector<1x16xf32>
    %c24 = arith.constant 24 : index
    %c0_14 = arith.constant 0 : index
    %13 = vector.load %arg3[%c24, %c0_14] : memref<256x16xbf16, #tpu.memory_space<vmem>>, vector<12x16xbf16>
    %c40_15 = arith.constant 40 : index
    %c0_16 = arith.constant 0 : index
    %14 = vector.load %arg3[%c40_15, %c0_16] : memref<256x16xbf16, #tpu.memory_space<vmem>>, vector<1x16xbf16>
    %15 = arith.extf %14 : vector<1x16xbf16> to vector<1x16xf32>
    %c48_17 = arith.constant 48 : index
    %c0_18 = arith.constant 0 : index
    %16 = vector.load %arg3[%c48_17, %c0_18] : memref<256x16xbf16, #tpu.memory_space<vmem>>, vector<24x16xbf16>
    %c72 = arith.constant 72 : index
    %c0_19 = arith.constant 0 : index
    %17 = vector.load %arg3[%c72, %c0_19] : memref<256x16xbf16, #tpu.memory_space<vmem>>, vector<1x16xbf16>
    %18 = arith.extf %17 : vector<1x16xbf16> to vector<1x16xf32>
    %c80_20 = arith.constant 80 : index
    %c0_21 = arith.constant 0 : index
    %19 = vector.load %arg3[%c80_20, %c0_21] : memref<256x16xbf16, #tpu.memory_space<vmem>>, vector<24x16xbf16>
    %c104 = arith.constant 104 : index
    %c0_22 = arith.constant 0 : index
    %20 = vector.load %arg3[%c104, %c0_22] : memref<256x16xbf16, #tpu.memory_space<vmem>>, vector<1x16xbf16>
    %21 = arith.extf %20 : vector<1x16xbf16> to vector<1x16xf32>
    %22 = vector.extract_strided_slice %7 {offsets = [0, 0], sizes = [8, 8], strides = [1, 1]} : vector<16x8xf32> to vector<8x8xf32>
    %23 = vector.extract_strided_slice %7 {offsets = [8, 0], sizes = [8, 8], strides = [1, 1]} : vector<16x8xf32> to vector<8x8xf32>
    %24 = arith.truncf %22 : vector<8x8xf32> to vector<8x8xbf16>
    %cst = arith.constant dense<0.000000e+00> : vector<16x8xf32>
    %25 = tpu.matmul %0, %24, %cst {dimension_numbers = #tpu.dot_dimension_numbers<[1], [0], [0], [1], [0, 0, 1, 1], [], []>} : vector<16x8xbf16>, vector<8x8xbf16>, vector<16x8xf32> -> vector<16x8xf32>
    %26 = vector.extract_strided_slice %9 {offsets = [0, 0], sizes = [16, 4], strides = [1, 1]} : vector<32x4xf32> to vector<16x4xf32>
    %27 = tpu.concatenate %25, %26 in 1 : vector<16x8xf32>, vector<16x4xf32> -> vector<16x12xf32>
    %28 = arith.truncf %27 : vector<16x12xf32> to vector<16x12xbf16>
    %cst_23 = arith.constant dense<0.000000e+00> : vector<16x16xf32>
    %29 = tpu.matmul %28, %10, %cst_23 {dimension_numbers = #tpu.dot_dimension_numbers<[1], [0], [0], [1], [0, 0, 1, 1], [], []>} : vector<16x12xbf16>, vector<12x16xbf16>, vector<16x16xf32> -> vector<16x16xf32>
    %30 = vector.broadcast %12 : vector<1x16xf32> to vector<16x16xf32>
    %31 = arith.addf %29, %30 : vector<16x16xf32>
    %cst_24 = arith.constant 0.000000e+00 : f32
    %32 = vector.broadcast %cst_24 : f32 to vector<16x16xf32>
    %33 = arith.maximumf %31, %32 : vector<16x16xf32>
    %34 = arith.truncf %33 : vector<16x16xf32> to vector<16x16xbf16>
    %cst_25 = arith.constant dense<0.000000e+00> : vector<8x16xf32>
    %35 = tpu.matmul %2, %34, %cst_25 {dimension_numbers = #tpu.dot_dimension_numbers<[1], [0], [0], [1], [0, 0, 1, 1], [], []>} : vector<8x16xbf16>, vector<16x16xbf16>, vector<8x16xf32> -> vector<8x16xf32>
    %36 = tpu.concatenate %35, %23 in 1 : vector<8x16xf32>, vector<8x8xf32> -> vector<8x24xf32>
    %37 = arith.truncf %36 : vector<8x24xf32> to vector<8x24xbf16>
    %cst_26 = arith.constant dense<0.000000e+00> : vector<8x16xf32>
    %38 = tpu.matmul %37, %16, %cst_26 {dimension_numbers = #tpu.dot_dimension_numbers<[1], [0], [0], [1], [0, 0, 1, 1], [], []>} : vector<8x24xbf16>, vector<24x16xbf16>, vector<8x16xf32> -> vector<8x16xf32>
    %39 = vector.broadcast %18 : vector<1x16xf32> to vector<8x16xf32>
    %40 = arith.addf %38, %39 : vector<8x16xf32>
    %cst_27 = arith.constant 0.000000e+00 : f32
    %41 = vector.broadcast %cst_27 : f32 to vector<8x16xf32>
    %42 = arith.maximumf %40, %41 : vector<8x16xf32>
    %43 = arith.mulf %42, %42 : vector<8x16xf32>
    %cst_28 = arith.constant dense<0.000000e+00> : vector<8xf32>
    %44 = vector.multi_reduction <add>, %43, %cst_28 [1] : vector<8x16xf32> to vector<8xf32>
    %45 = vector.shape_cast %44 : vector<8xf32> to vector<8x1xf32>
    %cst_29 = arith.constant 1.000000e-24 : f32
    %46 = vector.broadcast %cst_29 : f32 to vector<8x1xf32>
    %47 = arith.maximumf %45, %46 : vector<8x1xf32>
    %48 = math.rsqrt %47 : vector<8x1xf32>
    %49 = vector.broadcast %48 : vector<8x1xf32> to vector<8x16xf32>
    %50 = arith.mulf %42, %49 : vector<8x16xf32>
    %51 = arith.truncf %22 : vector<8x8xf32> to vector<8x8xbf16>
    %cst_30 = arith.constant dense<0.000000e+00> : vector<16x8xf32>
    %52 = tpu.matmul %1, %51, %cst_30 {dimension_numbers = #tpu.dot_dimension_numbers<[1], [0], [0], [1], [0, 0, 1, 1], [], []>} : vector<16x8xbf16>, vector<8x8xbf16>, vector<16x8xf32> -> vector<16x8xf32>
    %53 = vector.extract_strided_slice %9 {offsets = [16, 0], sizes = [16, 4], strides = [1, 1]} : vector<32x4xf32> to vector<16x4xf32>
    %54 = tpu.concatenate %52, %53 in 1 : vector<16x8xf32>, vector<16x4xf32> -> vector<16x12xf32>
    %55 = arith.truncf %54 : vector<16x12xf32> to vector<16x12xbf16>
    %cst_31 = arith.constant dense<0.000000e+00> : vector<16x16xf32>
    %56 = tpu.matmul %55, %13, %cst_31 {dimension_numbers = #tpu.dot_dimension_numbers<[1], [0], [0], [1], [0, 0, 1, 1], [], []>} : vector<16x12xbf16>, vector<12x16xbf16>, vector<16x16xf32> -> vector<16x16xf32>
    %57 = vector.broadcast %15 : vector<1x16xf32> to vector<16x16xf32>
    %58 = arith.addf %56, %57 : vector<16x16xf32>
    %cst_32 = arith.constant 0.000000e+00 : f32
    %59 = vector.broadcast %cst_32 : f32 to vector<16x16xf32>
    %60 = arith.maximumf %58, %59 : vector<16x16xf32>
    %61 = arith.truncf %60 : vector<16x16xf32> to vector<16x16xbf16>
    %cst_33 = arith.constant dense<0.000000e+00> : vector<8x16xf32>
    %62 = tpu.matmul %3, %61, %cst_33 {dimension_numbers = #tpu.dot_dimension_numbers<[1], [0], [0], [1], [0, 0, 1, 1], [], []>} : vector<8x16xbf16>, vector<16x16xbf16>, vector<8x16xf32> -> vector<8x16xf32>
    %63 = tpu.concatenate %62, %22 in 1 : vector<8x16xf32>, vector<8x8xf32> -> vector<8x24xf32>
    %64 = arith.truncf %63 : vector<8x24xf32> to vector<8x24xbf16>
    %cst_34 = arith.constant dense<0.000000e+00> : vector<8x16xf32>
    %65 = tpu.matmul %64, %19, %cst_34 {dimension_numbers = #tpu.dot_dimension_numbers<[1], [0], [0], [1], [0, 0, 1, 1], [], []>} : vector<8x24xbf16>, vector<24x16xbf16>, vector<8x16xf32> -> vector<8x16xf32>
    %66 = vector.broadcast %21 : vector<1x16xf32> to vector<8x16xf32>
    %67 = arith.addf %65, %66 : vector<8x16xf32>
    %cst_35 = arith.constant 0.000000e+00 : f32
    %68 = vector.broadcast %cst_35 : f32 to vector<8x16xf32>
    %69 = arith.maximumf %67, %68 : vector<8x16xf32>
    %70 = arith.mulf %69, %69 : vector<8x16xf32>
    %cst_36 = arith.constant dense<0.000000e+00> : vector<8xf32>
    %71 = vector.multi_reduction <add>, %70, %cst_36 [1] : vector<8x16xf32> to vector<8xf32>
    %72 = vector.shape_cast %71 : vector<8xf32> to vector<8x1xf32>
    %cst_37 = arith.constant 1.000000e-24 : f32
    %73 = vector.broadcast %cst_37 : f32 to vector<8x1xf32>
    %74 = arith.maximumf %72, %73 : vector<8x1xf32>
    %75 = math.rsqrt %74 : vector<8x1xf32>
    %76 = vector.broadcast %75 : vector<8x1xf32> to vector<8x16xf32>
    %77 = arith.mulf %69, %76 : vector<8x16xf32>
    %78 = tpu.concatenate %77, %50 in 0 : vector<8x16xf32>, vector<8x16xf32> -> vector<16x16xf32>
    %c0_38 = arith.constant 0 : index
    %c0_39 = arith.constant 0 : index
    %79 = vector.load %arg4[%c0_38, %c0_39] : memref<96x8xbf16, #tpu.memory_space<vmem>>, vector<36x8xbf16>
    %c40_40 = arith.constant 40 : index
    %c0_41 = arith.constant 0 : index
    %80 = vector.load %arg4[%c40_40, %c0_41] : memref<96x8xbf16, #tpu.memory_space<vmem>>, vector<1x8xbf16>
    %81 = arith.extf %80 : vector<1x8xbf16> to vector<1x8xf32>
    %82 = arith.truncf %78 : vector<16x16xf32> to vector<16x16xbf16>
    %cst_42 = arith.constant dense<0.000000e+00> : vector<32x16xf32>
    %83 = tpu.matmul %4, %82, %cst_42 {dimension_numbers = #tpu.dot_dimension_numbers<[1], [0], [0], [1], [0, 0, 1, 1], [], []>} : vector<32x16xbf16>, vector<16x16xbf16>, vector<32x16xf32> -> vector<32x16xf32>
    %84 = arith.truncf %78 : vector<16x16xf32> to vector<16x16xbf16>
    %cst_43 = arith.constant dense<0.000000e+00> : vector<32x16xf32>
    %85 = tpu.matmul %5, %84, %cst_43 {dimension_numbers = #tpu.dot_dimension_numbers<[1], [0], [0], [1], [0, 0, 1, 1], [], []>} : vector<32x16xbf16>, vector<16x16xbf16>, vector<32x16xf32> -> vector<32x16xf32>
    %86 = tpu.concatenate %83, %85, %9 in 1 : vector<32x16xf32>, vector<32x16xf32>, vector<32x4xf32> -> vector<32x36xf32>
    %87 = arith.truncf %86 : vector<32x36xf32> to vector<32x36xbf16>
    %cst_44 = arith.constant dense<0.000000e+00> : vector<32x8xf32>
    %88 = tpu.matmul %87, %79, %cst_44 {dimension_numbers = #tpu.dot_dimension_numbers<[1], [0], [0], [1], [0, 0, 1, 1], [], []>} : vector<32x36xbf16>, vector<36x8xbf16>, vector<32x8xf32> -> vector<32x8xf32>
    %89 = vector.broadcast %81 : vector<1x8xf32> to vector<32x8xf32>
    %90 = arith.addf %88, %89 : vector<32x8xf32>
    %cst_45 = arith.constant 0.000000e+00 : f32
    %91 = vector.broadcast %cst_45 : f32 to vector<32x8xf32>
    %92 = arith.maximumf %90, %91 : vector<32x8xf32>
    %c112 = arith.constant 112 : index
    %c0_46 = arith.constant 0 : index
    %93 = vector.load %arg3[%c112, %c0_46] : memref<256x16xbf16, #tpu.memory_space<vmem>>, vector<24x16xbf16>
    %c136 = arith.constant 136 : index
    %c0_47 = arith.constant 0 : index
    %94 = vector.load %arg3[%c136, %c0_47] : memref<256x16xbf16, #tpu.memory_space<vmem>>, vector<1x16xbf16>
    %95 = arith.extf %94 : vector<1x16xbf16> to vector<1x16xf32>
    %c144 = arith.constant 144 : index
    %c0_48 = arith.constant 0 : index
    %96 = vector.load %arg3[%c144, %c0_48] : memref<256x16xbf16, #tpu.memory_space<vmem>>, vector<24x16xbf16>
    %c168 = arith.constant 168 : index
    %c0_49 = arith.constant 0 : index
    %97 = vector.load %arg3[%c168, %c0_49] : memref<256x16xbf16, #tpu.memory_space<vmem>>, vector<1x16xbf16>
    %98 = arith.extf %97 : vector<1x16xbf16> to vector<1x16xf32>
    %c176 = arith.constant 176 : index
    %c0_50 = arith.constant 0 : index
    %99 = vector.load %arg3[%c176, %c0_50] : memref<256x16xbf16, #tpu.memory_space<vmem>>, vector<32x16xbf16>
    %c208 = arith.constant 208 : index
    %c0_51 = arith.constant 0 : index
    %100 = vector.load %arg3[%c208, %c0_51] : memref<256x16xbf16, #tpu.memory_space<vmem>>, vector<1x16xbf16>
    %101 = arith.extf %100 : vector<1x16xbf16> to vector<1x16xf32>
    %c216 = arith.constant 216 : index
    %c0_52 = arith.constant 0 : index
    %102 = vector.load %arg3[%c216, %c0_52] : memref<256x16xbf16, #tpu.memory_space<vmem>>, vector<32x16xbf16>
    %c248 = arith.constant 248 : index
    %c0_53 = arith.constant 0 : index
    %103 = vector.load %arg3[%c248, %c0_53] : memref<256x16xbf16, #tpu.memory_space<vmem>>, vector<1x16xbf16>
    %104 = arith.extf %103 : vector<1x16xbf16> to vector<1x16xf32>
    %105 = vector.extract_strided_slice %78 {offsets = [0, 0], sizes = [8, 16], strides = [1, 1]} : vector<16x16xf32> to vector<8x16xf32>
    %106 = vector.extract_strided_slice %78 {offsets = [8, 0], sizes = [8, 16], strides = [1, 1]} : vector<16x16xf32> to vector<8x16xf32>
    %107 = arith.truncf %105 : vector<8x16xf32> to vector<8x16xbf16>
    %cst_54 = arith.constant dense<0.000000e+00> : vector<16x16xf32>
    %108 = tpu.matmul %0, %107, %cst_54 {dimension_numbers = #tpu.dot_dimension_numbers<[1], [0], [0], [1], [0, 0, 1, 1], [], []>} : vector<16x8xbf16>, vector<8x16xbf16>, vector<16x16xf32> -> vector<16x16xf32>
    %109 = vector.extract_strided_slice %92 {offsets = [0, 0], sizes = [16, 8], strides = [1, 1]} : vector<32x8xf32> to vector<16x8xf32>
    %110 = tpu.concatenate %108, %109 in 1 : vector<16x16xf32>, vector<16x8xf32> -> vector<16x24xf32>
    %111 = arith.truncf %110 : vector<16x24xf32> to vector<16x24xbf16>
    %cst_55 = arith.constant dense<0.000000e+00> : vector<16x16xf32>
    %112 = tpu.matmul %111, %93, %cst_55 {dimension_numbers = #tpu.dot_dimension_numbers<[1], [0], [0], [1], [0, 0, 1, 1], [], []>} : vector<16x24xbf16>, vector<24x16xbf16>, vector<16x16xf32> -> vector<16x16xf32>
    %113 = vector.broadcast %95 : vector<1x16xf32> to vector<16x16xf32>
    %114 = arith.addf %112, %113 : vector<16x16xf32>
    %cst_56 = arith.constant 0.000000e+00 : f32
    %115 = vector.broadcast %cst_56 : f32 to vector<16x16xf32>
    %116 = arith.maximumf %114, %115 : vector<16x16xf32>
    %117 = arith.truncf %116 : vector<16x16xf32> to vector<16x16xbf16>
    %cst_57 = arith.constant dense<0.000000e+00> : vector<8x16xf32>
    %118 = tpu.matmul %2, %117, %cst_57 {dimension_numbers = #tpu.dot_dimension_numbers<[1], [0], [0], [1], [0, 0, 1, 1], [], []>} : vector<8x16xbf16>, vector<16x16xbf16>, vector<8x16xf32> -> vector<8x16xf32>
    %119 = tpu.concatenate %118, %106 in 1 : vector<8x16xf32>, vector<8x16xf32> -> vector<8x32xf32>
    %120 = arith.truncf %119 : vector<8x32xf32> to vector<8x32xbf16>
    %cst_58 = arith.constant dense<0.000000e+00> : vector<8x16xf32>
    %121 = tpu.matmul %120, %99, %cst_58 {dimension_numbers = #tpu.dot_dimension_numbers<[1], [0], [0], [1], [0, 0, 1, 1], [], []>} : vector<8x32xbf16>, vector<32x16xbf16>, vector<8x16xf32> -> vector<8x16xf32>
    %122 = vector.broadcast %101 : vector<1x16xf32> to vector<8x16xf32>
    %123 = arith.addf %121, %122 : vector<8x16xf32>
    %cst_59 = arith.constant 0.000000e+00 : f32
    %124 = vector.broadcast %cst_59 : f32 to vector<8x16xf32>
    %125 = arith.maximumf %123, %124 : vector<8x16xf32>
    %126 = arith.mulf %125, %125 : vector<8x16xf32>
    %cst_60 = arith.constant dense<0.000000e+00> : vector<8xf32>
    %127 = vector.multi_reduction <add>, %126, %cst_60 [1] : vector<8x16xf32> to vector<8xf32>
    %128 = vector.shape_cast %127 : vector<8xf32> to vector<8x1xf32>
    %cst_61 = arith.constant 1.000000e-24 : f32
    %129 = vector.broadcast %cst_61 : f32 to vector<8x1xf32>
    %130 = arith.maximumf %128, %129 : vector<8x1xf32>
    %131 = math.rsqrt %130 : vector<8x1xf32>
    %132 = vector.broadcast %131 : vector<8x1xf32> to vector<8x16xf32>
    %133 = arith.mulf %125, %132 : vector<8x16xf32>
    %134 = arith.truncf %105 : vector<8x16xf32> to vector<8x16xbf16>
    %cst_62 = arith.constant dense<0.000000e+00> : vector<16x16xf32>
    %135 = tpu.matmul %1, %134, %cst_62 {dimension_numbers = #tpu.dot_dimension_numbers<[1], [0], [0], [1], [0, 0, 1, 1], [], []>} : vector<16x8xbf16>, vector<8x16xbf16>, vector<16x16xf32> -> vector<16x16xf32>
    %136 = vector.extract_strided_slice %92 {offsets = [16, 0], sizes = [16, 8], strides = [1, 1]} : vector<32x8xf32> to vector<16x8xf32>
    %137 = tpu.concatenate %135, %136 in 1 : vector<16x16xf32>, vector<16x8xf32> -> vector<16x24xf32>
    %138 = arith.truncf %137 : vector<16x24xf32> to vector<16x24xbf16>
    %cst_63 = arith.constant dense<0.000000e+00> : vector<16x16xf32>
    %139 = tpu.matmul %138, %96, %cst_63 {dimension_numbers = #tpu.dot_dimension_numbers<[1], [0], [0], [1], [0, 0, 1, 1], [], []>} : vector<16x24xbf16>, vector<24x16xbf16>, vector<16x16xf32> -> vector<16x16xf32>
    %140 = vector.broadcast %98 : vector<1x16xf32> to vector<16x16xf32>
    %141 = arith.addf %139, %140 : vector<16x16xf32>
    %cst_64 = arith.constant 0.000000e+00 : f32
    %142 = vector.broadcast %cst_64 : f32 to vector<16x16xf32>
    %143 = arith.maximumf %141, %142 : vector<16x16xf32>
    %144 = arith.truncf %143 : vector<16x16xf32> to vector<16x16xbf16>
    %cst_65 = arith.constant dense<0.000000e+00> : vector<8x16xf32>
    %145 = tpu.matmul %3, %144, %cst_65 {dimension_numbers = #tpu.dot_dimension_numbers<[1], [0], [0], [1], [0, 0, 1, 1], [], []>} : vector<8x16xbf16>, vector<16x16xbf16>, vector<8x16xf32> -> vector<8x16xf32>
    %146 = tpu.concatenate %145, %105 in 1 : vector<8x16xf32>, vector<8x16xf32> -> vector<8x32xf32>
    %147 = arith.truncf %146 : vector<8x32xf32> to vector<8x32xbf16>
    %cst_66 = arith.constant dense<0.000000e+00> : vector<8x16xf32>
    %148 = tpu.matmul %147, %102, %cst_66 {dimension_numbers = #tpu.dot_dimension_numbers<[1], [0], [0], [1], [0, 0, 1, 1], [], []>} : vector<8x32xbf16>, vector<32x16xbf16>, vector<8x16xf32> -> vector<8x16xf32>
    %149 = vector.broadcast %104 : vector<1x16xf32> to vector<8x16xf32>
    %150 = arith.addf %148, %149 : vector<8x16xf32>
    %cst_67 = arith.constant 0.000000e+00 : f32
    %151 = vector.broadcast %cst_67 : f32 to vector<8x16xf32>
    %152 = arith.maximumf %150, %151 : vector<8x16xf32>
    %153 = arith.mulf %152, %152 : vector<8x16xf32>
    %cst_68 = arith.constant dense<0.000000e+00> : vector<8xf32>
    %154 = vector.multi_reduction <add>, %153, %cst_68 [1] : vector<8x16xf32> to vector<8xf32>
    %155 = vector.shape_cast %154 : vector<8xf32> to vector<8x1xf32>
    %cst_69 = arith.constant 1.000000e-24 : f32
    %156 = vector.broadcast %cst_69 : f32 to vector<8x1xf32>
    %157 = arith.maximumf %155, %156 : vector<8x1xf32>
    %158 = math.rsqrt %157 : vector<8x1xf32>
    %159 = vector.broadcast %158 : vector<8x1xf32> to vector<8x16xf32>
    %160 = arith.mulf %152, %159 : vector<8x16xf32>
    %161 = tpu.concatenate %160, %133 in 0 : vector<8x16xf32>, vector<8x16xf32> -> vector<16x16xf32>
    %162 = tpu.concatenate %78, %161 in 1 : vector<16x16xf32>, vector<16x16xf32> -> vector<16x32xf32>
    %c0_70 = arith.constant 0 : index
    %c0_71 = arith.constant 0 : index
    %163 = vector.load %arg5[%c0_70, %c0_71] : memref<16x32xf32, #tpu.memory_space<vmem>>, vector<16x32xf32>
    tpu.vector_store %arg5[%c0_70, %c0_71], %162 {strides = array<i32>} : memref<16x32xf32, #tpu.memory_space<vmem>>, vector<16x32xf32>,
    return
  }
}

</mosaic_0001>

<bundles_post_ra>
// kernel: tpu_custom_call.1
= control target key start
LH: loop header
LB: loop body
LE: loop exit
PB: predicated region body
PF: predicated region fallthrough
CT: control target
= control target key end

     0   :  { %vm76_vm0 = vcmask 1043456   ;;  %v1654_v1 = vmov 0.0   ;;  %vm1655_vm1 = vmmov 0   ;;  %vm72_vm2 = vcmask 64512   ;;  %s1656_s24 = smov 8   ;;  %s1996_s0 = inlined_call_operand.vmem [shape: bf16[16,8], index: 0, kind: input, shape index: {}]   ;;  %s1997_s1 = inlined_call_operand.vmem [shape: bf16[32,4], index: 1, kind: input, shape index: {}]   ;;  %s1998_s2 = inlined_call_operand.vmem [shape: bf16[112,16], index: 2, kind: input, shape index: {}]   ;;  %s1999_s3 = inlined_call_operand.vmem [shape: bf16[256,16], index: 3, kind: input, shape index: {}]   ;;  %s2000_s4 = inlined_call_operand.vmem [shape: bf16[96,8], index: 4, kind: input, shape index: {}]   ;;  %s2001_s5 = inlined_call_operand.hbm [shape: f32[16,32], index: 5, kind: output, shape index: {}]  }
   0x1   :  { %v1694_v0 = vld [vmem:[%s1996_s0] sm:$0xf]  ;;  %1420 = vmatprep.subr.bf16.mxu0 %v1654_v1  ;;  %1422 = vmatprep.mubr.msk.bf16.mxu0 %vm1655_vm1, %v1654_v1 }
   0x2   :  { %v1316_v2 = vcombine.low %v1694_v0, %v1694_v0  ;;  %v1363_v3 = vld [vmem:[%s1997_s1] sm:$0xff]   ;;  %1426 = vmatprep.subr.bf16.mxu1 %v1654_v1  ;;  %1428 = vmatprep.mubr.msk.bf16.mxu1 %vm1655_vm1, %v1654_v1 }
   0x3   :  { %v1707_v4 = vld [vmem:[%s1998_s2] sm:$0xff]   ;;  %v1364_v5 = vunpack.c.l.bf16 %v1363_v3  ;;  %v1365_v6 = vunpack.c.h.bf16 %v1363_v3 }
   0x4   :  { %v78_v7 = vsel %vm76_vm0, %v1316_v2, 0 }
   0x5   :  { %1421 = vmatpush3.bf16.msra.mxu0 %v78_v7  ;;  %v1713_v8 = vpack.i.bf16 %v1365_v6, %v1364_v5 }
   0x6   :  { %1432 = vmatprep.subr.bf16.mxu0 %v1654_v1 }
   0x7   :  { %1559 = vrot.lane.b32.xlu0 %v1713_v8, %s1656_s24 }
   0x8   :  { %1423 = vmatmul.mubr.msk.bf16.vlgmr.msra.gmra.mrb[0].mxu0 %vm72_vm2, %v1707_v4 }
   0x9   :  { %1434 = vmatprep.mubr.msk.bf16.mxu0 %vm1655_vm1, %v1654_v1 }
   0xa   :  { %10 = vsyncpa [#allocation3], 0  ;;  %v1600_v9 = vld [vmem:[%s1999_s3] sm:$0x3f]   ;;  %vm145_vm3 = vcmask 1045504   ;;  %vm141_vm4 = vcmask 97280   ;;  %v132_v28 = vlaneseq  ;;  %v38_v5 = vunpack.c.l.bf16 %v1694_v0 }
   0xb   :  { %v147_v10 = vsel %vm145_vm3, %v1600_v9, 0  ;;  %v37_v21 = vld [vmem:[%s1996_s0 + $0x4] sm:$0xf]  ;;  %v1370_v22 = vld [vmem:[%s1997_s1 + $0x8] sm:$0xff]   ;;  %v1603_v23 = vld [vmem:[%s1999_s3 + $0x18] sm:$0xff]   ;;  %s1657_s8 = smov 16  }
   0xc   :  { %1427 = vmatpush3.bf16.msra.mxu1 %v147_v10  ;;  %v39_v24 = vunpack.c.l.bf16 %v37_v21  ;;  %v1368_v25 = vunpack.c.l.bf16 %v1370_v22  ;;  %v1369_v26 = vunpack.c.h.bf16 %v1370_v22  ;;  %v133_v29 = vshrl.u32 %v132_v28, 7  ;;  %v50_v30 = vld [vmem:[%s1999_s3 + $0x8] sm:$0x1]  ;;  %v1756_v43 = vld [vmem:[%s1998_s2 + $0x10] sm:$0xf]  ;;  %s1658_s17 = smov 32  }
   0xd   :  { %1438 = vmatprep.subr.bf16.mxu1 %v1654_v1  ;;  %v51_v31 = vunpack.c.l.bf16 %v50_v30  ;;  %vm193_vm5 = vcmask 130048   ;;  %v1767_v44 = vld [vmem:[%s1998_s2 + $0x8] sm:$0xff]   ;;  %v1604_v45 = vld [vmem:[%s1999_s3 + $0x20] ss:$0 sps:$4 sm:$0xff]   ;;  %vm256_vm6 = vcmask 195584   ;;  %vm749_vm7 = vcmask 1041408  }
   0xe   :  { %238 = vrot.lane.b32.xlu0 %v39_v24, %s1657_s8  ;;  %v1742_v27 = vpack.i.bf16 %v1369_v26, %v1368_v25  ;;  %v1750_v32 = vsub.s32 0, %v133_v29  ;;  %v261_v46 = vsel %vm76_vm0, %v1604_v45, 0  ;;  %v1601_v47 = vld [vmem:[%s1999_s3 + $0xc] sm:$0x3f]   ;;  %v59_v6 = vld [vmem:[%s1999_s3 + $0x24] sm:$0x1] }
   0xf   :  { %v384_v52 = vsel %vm145_vm3, %v1601_v47, 0  ;;  %v1806_v30 = vld [vmem:[%s1998_s2 + $0x14] sm:$0xf]  ;;  %vm716_vm8 = vcmask 261120   ;;  %vm742_vm9 = vcmask 293888  }
  0x10   :  { %1564 = vrot.lane.b32.xlu1 %v1742_v27, %s1656_s24  ;;  %v135_v33 = vrot.slane %v51_v31, %v1750_v32  ;;  %v1605_v31 = vld [vmem:[%s1999_s3 + $0x28] sm:$0xff]  }
  0x14   :  { %474 = vrot.lane.b32.xlu1 %v38_v5, %s1657_s8  ;;  %v1608_v5 = vld [vmem:[%s1998_s2 + $0x30] sm:$0xff]  }
  0x79   :  { %v1560_v11 = vpop.permute.xlu0 %1559 }
  0x7a   :  { %v1562_v12 = vunpack.i.h.bf16 %v1560_v11  ;;  %v1561_v13 = vunpack.i.l.bf16 %v1560_v11  ;;  %v54_v11 = vld [vmem:[%s1999_s3 + $0x14] sm:$0x1] }
  0x7b   :  { %v55_v0 = vunpack.c.l.bf16 %v54_v11  ;;  %v1612_v11 = vld [vmem:[%s2000_s4 + $0x8] sm:$0xff]  }
  0x80   :  { %v239_v48 = vpop.permute.xlu0 %238 }
  0x82   :  { %v1565_v56 = vpop.permute.xlu1 %1564 }
  0x83   :  { %v1567_v57 = vunpack.i.h.bf16 %v1565_v56  ;;  %v1566_v58 = vunpack.i.l.bf16 %v1565_v56  ;;  %v1609_v56 = vld [vmem:[%s1998_s2 + $0x18] sm:$0xff]  }
  0xdb   :  { %v114_v14 = vpop.f32.mrb[0].mxu0 }
  0xdc   :  { %v1424_v15 = vpop.f32.mrb[1].mxu0  ;;  %v129_v17 = vsel %vm72_vm2, %v114_v14, %v1561_v13 }
  0xdd   :  { %v117_v16 = vpop.f32.mrb[2].mxu0 }
  0xde   :  { %v130_v18 = vsel %vm72_vm2, %v117_v16, %v1562_v12  ;;  %v1425_v19 = vpop.f32.mrb[3].mxu0 }
  0xdf   :  { %v131_v20 = vpack.c.bf16 %v130_v18, %v129_v17  ;;  %v374_v19 = vrot.slane %v55_v0, %v1750_v32 }
  0xe1   :  { %1429 = vmatmul.mubr.msk.bf16.vlgmr.msra.gmra.mrb[0].mxu1 %vm141_vm4, %v131_v20 }
  0xe2   :  { %1442 = vmatprep.mubr.msk.bf16.mxu1 %vm1655_vm1, %v1654_v1  ;;  %1439 = vmatpush3.bf16.msra.mxu1 %v1603_v23 }
  0xe3   :  { %1440 = vmatprep.subr.bf16.mxu1 %v1654_v1 }
  0xe6   :  { %1441 = vmatpush3.bf16.msra.mxu1 %v261_v46 }
  0xe7   :  { %1452 = vmatprep.subr.bf16.mxu1 %v1654_v1 }
 0x1b4   :  { %v183_v34 = vpop.f32.mrb[0].mxu1 }
 0x1b5   :  { %v184_v35 = vadd.f32 %v183_v34, %v135_v33  ;;  %v1430_v36 = vpop.f32.mrb[1].mxu1 }
 0x1b6   :  { %v186_v37 = vpop.f32.mrb[2].mxu1 }
 0x1b7   :  { %v187_v38 = vadd.f32 %v186_v37, %v135_v33  ;;  %v1431_v39 = vpop.f32.mrb[3].mxu1  ;;  %v190_v40 = vmax.f32 %v184_v35, 0.0  ;;  %v1606_v33 = vld [vmem:[%s1999_s3 + $0x30] ss:$0 sps:$4 sm:$0xff]   ;;  %v475_v35 = vpop.permute.xlu1 %474 }
 0x1b8   :  { %v496_v34 = vsel %vm76_vm0, %v1606_v33, 0 }
 0x1b9   :  { %v191_v41 = vmax.f32 %v187_v38, 0.0 }
 0x1bb   :  { %v192_v42 = vpack.c.bf16 %v191_v41, %v190_v40 }
 0x1bd   :  { %1433 = vmatpush3.bf16.msra.mxu0 %v192_v42  ;;  %v64_v42 = vld [vmem:[%s1999_s3 + $0x34] sm:$0x1] }
 0x1be   :  { %1446 = vmatprep.subr.bf16.mxu0 %v1654_v1  ;;  %v65_v45 = vunpack.c.l.bf16 %v64_v42 }
 0x1c0   :  { %1435 = vmatmul.mubr.msk.bf16.vlgmr.msra.gmra.mrb[4].mxu0 %vm193_vm5, %v1756_v43  ;;  %v482_v46 = vrot.slane %v65_v45, %v1750_v32 }
 0x1c1   :  { %1447 = vmatpush3.bf16.msra.mxu0 %v78_v7  ;;  %1448 = vmatprep.mubr.msk.bf16.mxu0 %vm1655_vm1, %v1654_v1  ;;  %v60_v7 = vunpack.c.l.bf16 %v59_v6 }
 0x1c2   :  { %1458 = vmatprep.subr.bf16.mxu0 %v1654_v1 }
 0x1c3   :  { %v246_v9 = vrot.slane %v60_v7, %v1750_v32  ;;  %v1610_v7 = vld [vmem:[%s1998_s2 + $0x20] sm:$0xff]  }
 0x1c8   :  { %1449 = vmatmul.mubr.msk.bf16.vlgmr.msra.gmra.mrb[8].mxu0 %vm72_vm2, %v1767_v44 }
 0x1c9   :  { %1460 = vmatprep.mubr.msk.bf16.mxu0 %vm1655_vm1, %v1654_v1 }
 0x293   :  { %v231_v49 = vpop.f32.mrb[4].mxu0 }
 0x294   :  { %v241_v50 = vsel %vm193_vm5, %v231_v49, %v239_v48  ;;  %v1436_v51 = vpop.f32.mrb[5].mxu0 }
 0x295   :  { %v242_v53 = vpack.c.bf16 %v241_v50, %v241_v50  ;;  %v234_v54 = vpop.f32.mrb[6].mxu0 }
 0x296   :  { %v1437_v55 = vpop.f32.mrb[7].mxu0 }
 0x297   :  { %1443 = vmatmul.mubr.msk.bf16.vlgmr.msra.gmra.mrb[4].mxu1 %vm256_vm6, %v242_v53  ;;  %v1607_v55 = vld [vmem:[%s1998_s2 + $0x28] sm:$0xff]  }
 0x298   :  { %1453 = vmatpush3.bf16.msra.mxu1 %v384_v52  ;;  %1454 = vmatprep.mubr.msk.bf16.mxu1 %vm1655_vm1, %v1654_v1 }
 0x299   :  { %1464 = vmatprep.subr.bf16.mxu1 %v1654_v1 }
 0x29b   :  { %v353_v59 = vpop.f32.mrb[8].mxu0 }
 0x29c   :  { %v1450_v60 = vpop.f32.mrb[9].mxu0  ;;  %v368_v62 = vsel %vm72_vm2, %v353_v59, %v1566_v58 }
 0x29d   :  { %v356_v61 = vpop.f32.mrb[10].mxu0 }
 0x29e   :  { %v369_v63 = vsel %vm72_vm2, %v356_v61, %v1567_v57  ;;  %v1451_v2 = vpop.f32.mrb[11].mxu0 }
 0x29f   :  { %v370_v3 = vpack.c.bf16 %v369_v63, %v368_v62 }
 0x2a1   :  { %1455 = vmatmul.mubr.msk.bf16.vlgmr.msra.gmra.mrb[8].mxu1 %vm141_vm4, %v370_v3 }
 0x2a2   :  { %1468 = vmatprep.mubr.msk.bf16.mxu1 %vm1655_vm1, %v1654_v1  ;;  %1465 = vmatpush3.bf16.msra.mxu1 %v1605_v31 }
 0x2a3   :  { %1466 = vmatprep.subr.bf16.mxu1 %v1654_v1 }
 0x2a6   :  { %1467 = vmatpush3.bf16.msra.mxu1 %v496_v34 }
 0x36a   :  { %v297_v10 = vpop.f32.mrb[4].mxu1 }
 0x36b   :  { %v298_v12 = vadd.f32 %v297_v10, %v246_v9  ;;  %v1444_v13 = vpop.f32.mrb[5].mxu1  ;;  %v1611_v10 = vld [vmem:[%s2000_s4] sm:$0xff]  }
 0x36c   :  { %v300_v14 = vpop.f32.mrb[6].mxu1 }
 0x36d   :  { %v303_v15 = vmax.f32 %v298_v12, 0.0  ;;  %v1445_v16 = vpop.f32.mrb[7].mxu1  ;;  %v1613_v12 = vld [vmem:[%s2000_s4 + $0x10] ss:$0 sps:$4 sm:$0x33]  }
 0x36f   :  { %v304_v17 = vmul.f32 %v303_v15, %v303_v15 }
 0x371   :  { %v305_v18 = vsel %vm193_vm5, %v304_v17, 0.0 }
 0x372   :  { %306 = vadd.xlane.f32.xlu0 %v305_v18 }
 0x374   :  { %v420_v20 = vpop.f32.mrb[8].mxu1 }
 0x375   :  { %v421_v21 = vadd.f32 %v420_v20, %v374_v19  ;;  %v1456_v22 = vpop.f32.mrb[9].mxu1 }
 0x376   :  { %v423_v23 = vpop.f32.mrb[10].mxu1 }
 0x377   :  { %v424_v24 = vadd.f32 %v423_v23, %v374_v19  ;;  %v1457_v25 = vpop.f32.mrb[11].mxu1  ;;  %v427_v26 = vmax.f32 %v421_v21, 0.0 }
 0x379   :  { %v428_v28 = vmax.f32 %v424_v24, 0.0 }
 0x37b   :  { %v429_v29 = vpack.c.bf16 %v428_v28, %v427_v26 }
 0x37d   :  { %1459 = vmatpush3.bf16.msra.mxu0 %v429_v29 }
 0x380   :  { %1461 = vmatmul.mubr.msk.bf16.vlgmr.msra.gmra.mrb[12].mxu0 %vm193_vm5, %v1806_v30 }
 0x381   :  { %1474 = vmatprep.mubr.msk.bf16.mxu0 %vm193_vm5, %v1609_v56 }
 0x3ff   :  { %v307_v57 = vpop.xlane.xlu0 %306 }
 0x400   :  { %v308_v58 = vmax.f32 %v307_v57, 1e-24 }
 0x402   :  { %1622 = vrsqrt.f32 %v308_v58 }
 0x40c   :  { %v1623_v61 = vpop.eup %1622 }
 0x40d   :  { %v1835_v2 = vmul.f32 %v1623_v61, %v303_v15 }
 0x453   :  { %v467_v36 = vpop.f32.mrb[12].mxu0 }
 0x454   :  { %v477_v37 = vsel %vm193_vm5, %v467_v36, %v475_v35  ;;  %v1462_v38 = vpop.f32.mrb[13].mxu0 }
 0x455   :  { %v478_v39 = vpack.c.bf16 %v477_v37, %v477_v37  ;;  %v470_v40 = vpop.f32.mrb[14].mxu0 }
 0x456   :  { %v1463_v41 = vpop.f32.mrb[15].mxu0 }
 0x457   :  { %1469 = vmatmul.mubr.msk.bf16.vlgmr.msra.gmra.mrb[12].mxu1 %vm256_vm6, %v478_v39 }
 0x458   :  { %1480 = vmatprep.mubr.msk.bf16.mxu1 %vm193_vm5, %v1607_v55 }
 0x52a   :  { %v532_v47 = vpop.f32.mrb[12].mxu1 }
 0x52b   :  { %v533_v48 = vadd.f32 %v532_v47, %v482_v46  ;;  %v1470_v49 = vpop.f32.mrb[13].mxu1 }
 0x52c   :  { %v535_v50 = vpop.f32.mrb[14].mxu1 }
 0x52d   :  { %v538_v51 = vmax.f32 %v533_v48, 0.0  ;;  %v1471_v52 = vpop.f32.mrb[15].mxu1  ;;  %v1614_v48 = vld [vmem:[%s1999_s3 + $0x38] sm:$0xff]  }
 0x52e   :  { %v551_v52 = vld [vmem:[%s2000_s4 + $0x14] sm:$0x1] }
 0x52f   :  { %v539_v53 = vmul.f32 %v538_v51, %v538_v51 }
 0x531   :  { %v540_v54 = vsel %vm193_vm5, %v539_v53, 0.0  ;;  %v552_v53 = vunpack.c.l.bf16 %v551_v52  ;;  %v820_v52 = vld [vmem:[%s1999_s3 + $0x68] sm:$0x1] }
 0x532   :  { %541 = vadd.xlane.f32.xlu1 %v540_v54  ;;  %v1615_v54 = vld [vmem:[%s1999_s3 + $0x40] ss:$0 sps:$4 sm:$0xff]  }
 0x533   :  { %v726_v55 = vrot.slane %v552_v53, %v1750_v32  ;;  %v901_v56 = vsel %vm76_vm0, %v1615_v54, 0  ;;  %v821_v53 = vunpack.c.l.bf16 %v820_v52 }
 0x535   :  { %v996_v54 = vrot.slane %v821_v53, %v1750_v32 }
 0x5bf   :  { %v542_v59 = vpop.xlane.xlu1 %541 }
 0x5c0   :  { %v543_v60 = vmax.f32 %v542_v59, 1e-24 }
 0x5c2   :  { %1624 = vrsqrt.f32 %v543_v60 }
 0x5cc   :  { %v1625_v62 = vpop.eup %1624 }
 0x5cd   :  { %v1833_v63 = vmul.f32 %v1625_v62, %v538_v51 }
 0x5cf   :  { %v553_v3 = vpack.c.bf16 %v1835_v2, %v1833_v63  ;;  %v828_v6 = vpack.c.bf16 %v1833_v63, %v1833_v63 }
 0x5d1   :  { %1472 = vmatprep.subr.bf16.mxu0 %v553_v3  ;;  %1478 = vmatprep.subr.bf16.mxu1 %v553_v3  ;;  %v1850_v9 = vsel %vm76_vm0, %v828_v6, 0 }
 0x5d2   :  { %1473 = vmatpush3.bf16.msra.mxu0 %v553_v3  ;;  %1479 = vmatpush3.bf16.msra.mxu1 %v553_v3 }
 0x5d3   :  { %1494 = vmatprep.subr.bf16.mxu1 %v1654_v1  ;;  %1484 = vmatprep.subr.bf16.mxu0 %v1611_v10 }
 0x5d5   :  { %1481 = vmatmul.mubr.msk.bf16.vlgmr.msra.gmra.mrb[16].mxu1 %vm193_vm5, %v1608_v5  ;;  %1475 = vmatmul.mubr.msk.bf16.vlgmr.msra.gmra.mrb[16].mxu0 %vm193_vm5, %v1610_v7 }
 0x5d6   :  { %1495 = vmatpush3.bf16.msra.mxu1 %v1850_v9  ;;  %1496 = vmatprep.mubr.msk.bf16.mxu1 %vm1655_vm1, %v1654_v1 }
 0x5d7   :  { %1500 = vmatprep.subr.bf16.mxu1 %v1654_v1  ;;  %1485 = vmatpush3.bf16.msra.mxu0 %v1611_v10 }
 0x5d8   :  { %1486 = vmatprep.subr.bf16.mxu0 %v1612_v11 }
 0x5db   :  { %1487 = vmatpush3.bf16.msra.mxu0 %v1612_v11 }
 0x5dc   :  { %1550 = vmatprep.subr.msk.bf16.mxu0 %vm749_vm7, %v1613_v12 }
 0x5dd   :  { %1497 = vmatmul.mubr.msk.bf16.vlgmr.msra.gmra.mrb[20].mxu1 %vm72_vm2, %v1707_v4  ;;  %v751_v4 = vsel %vm749_vm7, %v1613_v12, 0 }
 0x5de   :  { %1504 = vmatprep.mubr.msk.bf16.mxu1 %vm1655_vm1, %v1654_v1  ;;  %1501 = vmatpush3.bf16.msra.mxu1 %v1614_v48 }
 0x5df   :  { %1489 = vmatpush3.bf16.msra.mxu0 %v751_v4  ;;  %1502 = vmatprep.subr.bf16.mxu1 %v1654_v1 }
 0x5e0   :  { %1508 = vmatprep.subr.bf16.mxu0 %v1654_v1 }
 0x5e2   :  { %1503 = vmatpush3.bf16.msra.mxu1 %v901_v56  ;;  %v814_v56 = vld [vmem:[%s1999_s3 + $0x54] sm:$0x1] }
 0x5e3   :  { %1514 = vmatprep.subr.bf16.mxu1 %v1654_v1 }
 0x6a8   :  { %v1482_v13 = vpop.f32.mrb[16].mxu1  ;;  %v1476_v14 = vpop.f32.mrb[16].mxu0 }
 0x6a9   :  { %v669_v15 = vpop.f32.mrb[17].mxu1  ;;  %v604_v16 = vpop.f32.mrb[17].mxu0 }
 0x6aa   :  { %v1483_v0 = vpop.f32.mrb[18].mxu1  ;;  %v1477_v17 = vpop.f32.mrb[18].mxu0 }
 0x6ab   :  { %v1568_v18 = vpack.i.bf16 %v1483_v0, %v1482_v13  ;;  %v672_v19 = vpop.f32.mrb[19].mxu1  ;;  %v607_v20 = vpop.f32.mrb[19].mxu0 }
 0x6ac   :  { %v1573_v21 = vpack.i.bf16 %v672_v19, %v669_v15  ;;  %v809_v19 = vld [vmem:[%s1999_s3 + $0x44] sm:$0x1] }
 0x6ad   :  { %1569 = vrot.lane.b32.xlu1 %v1568_v18, %s1657_s8  ;;  %v1616_v18 = vld [vmem:[%s1999_s3 + $0x58] sm:$0xff]  }
 0x6ae   :  { %1574 = vrot.lane.b32.xlu0 %v1573_v21, %s1657_s8 }
 0x6b0   :  { %v866_v47 = vpop.f32.mrb[20].mxu1 }
 0x6b1   :  { %1584 = vrot.lane.b32.xlu1 %v1742_v27, %s1658_s17  ;;  %v1498_v49 = vpop.f32.mrb[21].mxu1 }
 0x6b2   :  { %1579 = vrot.lane.b32.xlu0 %v1713_v8, %s1658_s17  ;;  %v869_v50 = vpop.f32.mrb[22].mxu1 }
 0x6b3   :  { %v1499_v51 = vpop.f32.mrb[23].mxu1 }
 0x6b5   :  { %988 = vrot.lane.b32.xlu1 %v1835_v2, %s1657_s8 }
 0x6b9   :  { %1216 = vrot.lane.b32.xlu1 %v1833_v63, %s1657_s8 }
 0x71f   :  { %v1570_v22 = vpop.permute.xlu1 %1569 }
 0x720   :  { %v1575_v23 = vpop.permute.xlu0 %1574  ;;  %v1572_v24 = vunpack.i.h.bf16 %v1570_v22  ;;  %v1571_v25 = vunpack.i.l.bf16 %v1570_v22 }
 0x721   :  { %v1577_v26 = vunpack.i.h.bf16 %v1575_v23  ;;  %v1576_v28 = vunpack.i.l.bf16 %v1575_v23 }
 0x722   :  { %v714_v27 = vsel %vm193_vm5, %v1476_v14, %v1571_v25  ;;  %v715_v8 = vsel %vm193_vm5, %v1477_v17, %v1572_v24 }
 0x723   :  { %v1585_v29 = vpop.permute.xlu1 %1584  ;;  %v712_v37 = vsel %vm193_vm5, %v604_v16, %v1576_v28  ;;  %v713_v38 = vsel %vm193_vm5, %v607_v20, %v1577_v26  ;;  %v810_v20 = vunpack.c.l.bf16 %v809_v19 }
 0x724   :  { %v1587_v31 = vunpack.i.h.bf16 %v1585_v29  ;;  %v1586_v33 = vunpack.i.l.bf16 %v1585_v29  ;;  %v1580_v34 = vpop.permute.xlu0 %1579 }
 0x725   :  { %v1582_v35 = vunpack.i.h.bf16 %v1580_v34  ;;  %v1581_v36 = vunpack.i.l.bf16 %v1580_v34  ;;  %v887_v21 = vrot.slane %v810_v20, %v1750_v32  ;;  %v1617_v34 = vld [vmem:[%s1999_s3 + $0x60] sm:$0xff]  }
 0x726   :  { %v719_v39 = vsel %vm716_vm8, %v714_v27, %v1586_v33  ;;  %v720_v40 = vsel %vm716_vm8, %v715_v8, %v1587_v31 }
 0x727   :  { %v722_v41 = vpack.c.bf16 %v720_v40, %v719_v39  ;;  %v717_v42 = vsel %vm716_vm8, %v712_v37, %v1581_v36  ;;  %v718_v45 = vsel %vm716_vm8, %v713_v38, %v1582_v35  ;;  %v1618_v35 = vld [vmem:[%s1999_s3 + $0x48] sm:$0xff]   ;;  %v1619_v37 = vld [vmem:[%s1999_s3 + $0x50] ss:$0 sps:$4 sm:$0xff]  }
 0x728   :  { %v721_v46 = vpack.c.bf16 %v718_v45, %v717_v42  ;;  %v1129_v40 = vsel %vm76_vm0, %v1619_v37, 0 }
 0x72a   :  { %1490 = vmatprep.mubr.msk.bf16.mxu0 %vm742_vm9, %v721_v46 }
 0x72b   :  { %1491 = vmatmul.mubr.msk.bf16.vlgmr.msra.gmra.mrb[20].mxu0 %vm742_vm9, %v722_v41 }
 0x72c   :  { %1510 = vmatprep.mubr.msk.bf16.mxu0 %vm1655_vm1, %v1654_v1 }
 0x7fe   :  { %v1492_v57 = vpop.f32.mrb[20].mxu0 }
 0x7ff   :  { %v796_v58 = vadd.f32 %v1492_v57, %v726_v55  ;;  %v787_v59 = vpop.f32.mrb[21].mxu0 }
 0x800   :  { %v788_v60 = vadd.f32 %v787_v59, %v726_v55  ;;  %v1493_v61 = vpop.f32.mrb[22].mxu0 }
 0x801   :  { %v799_v62 = vadd.f32 %v1493_v61, %v726_v55  ;;  %v790_v3 = vpop.f32.mrb[23].mxu0  ;;  %v804_v6 = vmax.f32 %v796_v58, 0.0 }
 0x802   :  { %v791_v5 = vadd.f32 %v790_v3, %v726_v55  ;;  %v802_v10 = vmax.f32 %v788_v60, 0.0 }
 0x803   :  { %v805_v7 = vmax.f32 %v799_v62, 0.0  ;;  %v815_v62 = vunpack.c.l.bf16 %v814_v56 }
 0x804   :  { %v803_v11 = vmax.f32 %v791_v5, 0.0 }
 0x805   :  { %v1593_v12 = vpack.i.bf16 %v805_v7, %v804_v6  ;;  %v1115_v6 = vrot.slane %v815_v62, %v1750_v32 }
 0x806   :  { %v1588_v4 = vpack.i.bf16 %v803_v11, %v802_v10 }
 0x808   :  { %1589 = vrot.lane.b32.xlu0 %v1588_v4, %s1657_s8 }
 0x80c   :  { %1594 = vrot.lane.b32.xlu0 %v1593_v12, %s1657_s8 }
 0x87a   :  { %v1590_v13 = vpop.permute.xlu0 %1589 }
 0x87b   :  { %v1592_v14 = vunpack.i.h.bf16 %v1590_v13  ;;  %v1591_v15 = vunpack.i.l.bf16 %v1590_v13 }
 0x87d   :  { %v882_v16 = vsel %vm193_vm5, %v869_v50, %v1592_v14  ;;  %v881_v0 = vsel %vm193_vm5, %v866_v47, %v1591_v15 }
 0x87e   :  { %v883_v17 = vpack.c.bf16 %v882_v16, %v881_v0  ;;  %v1595_v39 = vpop.permute.xlu0 %1594  ;;  %v1620_v0 = vld [vmem:[%s1999_s3 + $0x6c] sm:$0xff]  }
 0x87f   :  { %v1597_v42 = vunpack.i.h.bf16 %v1595_v39  ;;  %v1596_v45 = vunpack.i.l.bf16 %v1595_v39 }
 0x880   :  { %1505 = vmatmul.mubr.msk.bf16.vlgmr.msra.gmra.mrb[24].mxu1 %vm256_vm6, %v883_v17  ;;  %v1621_v17 = vld [vmem:[%s1999_s3 + $0x74] sm:$0xff]  }
 0x881   :  { %1518 = vmatprep.mubr.msk.bf16.mxu1 %vm1655_vm1, %v1654_v1  ;;  %1515 = vmatpush3.bf16.msra.mxu1 %v1616_v18 }
 0x882   :  { %1516 = vmatprep.subr.bf16.mxu1 %v1654_v1 }
 0x885   :  { %1517 = vmatpush3.bf16.msra.mxu1 %v1617_v34 }
 0x886   :  { %1528 = vmatprep.subr.bf16.mxu1 %v1654_v1 }
 0x953   :  { %v937_v22 = vpop.f32.mrb[24].mxu1 }
 0x954   :  { %v938_v23 = vadd.f32 %v937_v22, %v887_v21  ;;  %v1506_v24 = vpop.f32.mrb[25].mxu1 }
 0x955   :  { %v940_v25 = vpop.f32.mrb[26].mxu1  ;;  %v826_v24 = vld [vmem:[%s1999_s3 + $0x7c] sm:$0x1]  ;;  %s1659_s3 = smov [#allocation2]  }
 0x956   :  { %v941_v26 = vadd.f32 %v940_v25, %v887_v21  ;;  %v1507_v28 = vpop.f32.mrb[27].mxu1  ;;  %v944_v29 = vmax.f32 %v938_v23, 0.0  ;;  %s1305_s17 = sshll.u32 %s1659_s3, 4  ;;  %s1306_s17 = int_to_ptr.vmem [resolvable:$true] %s1305_s17 }
 0x957   :  { %s1630_s18 = scalar_lea.vmem %s1306_s17, 256  ;;  %p1635_p1 = scmp.lt.s32.totalorder %s1306_s17, %s1306_s17 }
 0x958   :  { %v945_v31 = vmax.f32 %v941_v26, 0.0  ;;  %p1631_p0 = scmp.ne.s32.totalorder %s1306_s17, %s1630_s18  ;;  %p1636_p2 = scmp.lt.s32.totalorder %s1630_s18, %s1630_s18 }
 0x95a   :  { %v946_v33 = vpack.c.bf16 %v945_v31, %v944_v29  ;;  %p1637_p3 = por %p1636_p2, %p1635_p1 }
 0x95c   :  { %1509 = vmatpush3.bf16.msra.mxu0 %v946_v33  ;;  %p1638_p4 = pnand %p1637_p3, %p1631_p0 }
 0x95d   :  { %1522 = vmatprep.subr.bf16.mxu0 %v1654_v1 }
 0x95f   :  { %1511 = vmatmul.mubr.msk.bf16.vlgmr.msra.gmra.mrb[24].mxu0 %vm193_vm5, %v1756_v43  ;;  %v989_v43 = vpop.permute.xlu1 %988 }
 0x960   :  { %1523 = vmatpush3.bf16.msra.mxu0 %v1850_v9  ;;  %1524 = vmatprep.mubr.msk.bf16.mxu0 %vm1655_vm1, %v1654_v1 }
 0x961   :  { %1536 = vmatprep.subr.bf16.mxu0 %v1654_v1 }
 0x963   :  { %v1217_v18 = vpop.permute.xlu1 %1216 }
 0x967   :  { %1525 = vmatmul.mubr.msk.bf16.vlgmr.msra.gmra.mrb[28].mxu0 %vm72_vm2, %v1767_v44 }
 0x968   :  { %1538 = vmatprep.mubr.msk.bf16.mxu0 %vm1655_vm1, %v1654_v1 }
 0xa32   :  { %v981_v9 = vpop.f32.mrb[24].mxu0 }
 0xa33   :  { %v991_v27 = vsel %vm193_vm5, %v981_v9, %v989_v43  ;;  %v1512_v8 = vpop.f32.mrb[25].mxu0 }
 0xa34   :  { %v992_v44 = vpack.c.bf16 %v991_v27, %v991_v27  ;;  %v984_v36 = vpop.f32.mrb[26].mxu0 }
 0xa35   :  { %v1513_v38 = vpop.f32.mrb[27].mxu0 }
 0xa36   :  { %1519 = vmatmul.mubr.msk.bf16.vlgmr.msra.gmra.mrb[28].mxu1 %vm716_vm8, %v992_v44 }
 0xa37   :  { %1529 = vmatpush3.bf16.msra.mxu1 %v1618_v35  ;;  %1532 = vmatprep.mubr.msk.bf16.mxu1 %vm1655_vm1, %v1654_v1 }
 0xa38   :  { %1530 = vmatprep.subr.bf16.mxu1 %v1654_v1 }
 0xa3a   :  { %v1094_v41 = vpop.f32.mrb[28].mxu0 }
 0xa3b   :  { %v1526_v46 = vpop.f32.mrb[29].mxu0  ;;  %1531 = vmatpush3.bf16.msra.mxu1 %v1129_v40  ;;  %v1109_v48 = vsel %vm193_vm5, %v1094_v41, %v1596_v45 }
 0xa3c   :  { %v1097_v47 = vpop.f32.mrb[30].mxu0  ;;  %1542 = vmatprep.subr.bf16.mxu1 %v1654_v1 }
 0xa3d   :  { %v1110_v49 = vsel %vm193_vm5, %v1097_v47, %v1597_v42  ;;  %v1527_v50 = vpop.f32.mrb[31].mxu0 }
 0xa3e   :  { %v1111_v51 = vpack.c.bf16 %v1110_v49, %v1109_v48 }
 0xa40   :  { %1533 = vmatmul.mubr.msk.bf16.vlgmr.msra.gmra.mrb[32].mxu1 %vm256_vm6, %v1111_v51 }
 0xa41   :  { %1546 = vmatprep.mubr.msk.bf16.mxu1 %vm1655_vm1, %v1654_v1  ;;  %1543 = vmatpush3.bf16.msra.mxu1 %v1620_v0 }
 0xa42   :  { %1544 = vmatprep.subr.bf16.mxu1 %v1654_v1  ;;  %v827_v1 = vunpack.c.l.bf16 %v826_v24 }
 0xa44   :  { %v1224_v25 = vrot.slane %v827_v1, %v1750_v32 }
 0xa45   :  { %1545 = vmatpush3.bf16.msra.mxu1 %v1621_v17 }
 0xb09   :  { %v1046_v55 = vpop.f32.mrb[28].mxu1 }
 0xb0a   :  { %v1047_v57 = vadd.f32 %v1046_v55, %v996_v54  ;;  %v1520_v58 = vpop.f32.mrb[29].mxu1 }
 0xb0b   :  { %v1049_v59 = vpop.f32.mrb[30].mxu1 }
 0xb0c   :  { %v1052_v60 = vmax.f32 %v1047_v57, 0.0  ;;  %v1521_v61 = vpop.f32.mrb[31].mxu1 }
 0xb0e   :  { %v1053_v3 = vmul.f32 %v1052_v60, %v1052_v60 }
 0xb10   :  { %v1054_v5 = vsel %vm193_vm5, %v1053_v3, 0.0 }
 0xb11   :  { %1055 = vadd.xlane.f32.xlu0 %v1054_v5 }
 0xb13   :  { %v1165_v7 = vpop.f32.mrb[32].mxu1 }
 0xb14   :  { %v1166_v10 = vadd.f32 %v1165_v7, %v1115_v6  ;;  %v1534_v11 = vpop.f32.mrb[33].mxu1 }
 0xb15   :  { %v1168_v12 = vpop.f32.mrb[34].mxu1 }
 0xb16   :  { %v1169_v4 = vadd.f32 %v1168_v12, %v1115_v6  ;;  %v1535_v13 = vpop.f32.mrb[35].mxu1  ;;  %v1172_v14 = vmax.f32 %v1166_v10, 0.0 }
 0xb18   :  { %v1173_v15 = vmax.f32 %v1169_v4, 0.0 }
 0xb1a   :  { %v1174_v16 = vpack.c.bf16 %v1173_v15, %v1172_v14 }
 0xb1c   :  { %1537 = vmatpush3.bf16.msra.mxu0 %v1174_v16 }
 0xb1f   :  { %1539 = vmatmul.mubr.msk.bf16.vlgmr.msra.gmra.mrb[32].mxu0 %vm193_vm5, %v1806_v30 }
 0xb9e   :  { %v1056_v33 = vpop.xlane.xlu0 %1055 }
 0xb9f   :  { %v1057_v27 = vmax.f32 %v1056_v33, 1e-24 }
 0xba1   :  { %1626 = vrsqrt.f32 %v1057_v27 }
 0xbab   :  { %v1627_v35 = vpop.eup %1626 }
 0xbac   :  { %v1059_v44 = vmul.f32 %v1627_v35, %v1052_v60 }
 0xbf2   :  { %v1209_v19 = vpop.f32.mrb[32].mxu0 }
 0xbf3   :  { %v1219_v20 = vsel %vm193_vm5, %v1209_v19, %v1217_v18  ;;  %v1540_v21 = vpop.f32.mrb[33].mxu0 }
 0xbf4   :  { %v1220_v22 = vpack.c.bf16 %v1219_v20, %v1219_v20  ;;  %v1212_v23 = vpop.f32.mrb[34].mxu0 }
 0xbf5   :  { %v1541_v30 = vpop.f32.mrb[35].mxu0 }
 0xbf6   :  { %1547 = vmatmul.mubr.msk.bf16.vlgmr.msra.gmra.mrb[36].mxu1 %vm716_vm8, %v1220_v22 }
 0xcc9   :  { %v1274_v26 = vpop.f32.mrb[36].mxu1 }
 0xcca   :  { %v1275_v28 = vadd.f32 %v1274_v26, %v1224_v25  ;;  %v1548_v29 = vpop.f32.mrb[37].mxu1 }
 0xccb   :  { %v1277_v31 = vpop.f32.mrb[38].mxu1 }
 0xccc   :  { %v1280_v34 = vmax.f32 %v1275_v28, 0.0  ;;  %v1549_v43 = vpop.f32.mrb[39].mxu1 }
 0xcce   :  { %v1281_v9 = vmul.f32 %v1280_v34, %v1280_v34 }
 0xcd0   :  { %v1282_v8 = vsel %vm193_vm5, %v1281_v9, 0.0 }
 0xcd1   :  { %1283 = vadd.xlane.f32.xlu1 %v1282_v8 }
 0xce2   :  { %1292 = vrot.lane.b32.xlu1 %v1059_v44, %s1657_s8 }
 0xd5e   :  { %v1284_v36 = vpop.xlane.xlu1 %1283 }
 0xd5f   :  { %v1285_v37 = vmax.f32 %v1284_v36, 1e-24 }
 0xd61   :  { %1628 = vrsqrt.f32 %v1285_v37 }
 0xd62   :  { %v1293_v32 = vpop.permute.xlu1 %1292 }
 0xd63   :  { %v1297_v38 = vsel %vm193_vm5, %v1835_v2, %v1293_v32 }
 0xd64   :  { %1299 = vst.msk [vmem:[#allocation2 + $0x8] sm:$0xff] %vm716_vm8, %v1297_v38 }
 0xd6b   :  { %v1629_v39 = vpop.eup %1628 }
 0xd6c   :  { %v1287_v40 = vmul.f32 %v1629_v39, %v1280_v34 }
 0xd6e   :  { %1290 = vrot.lane.b32.xlu0 %v1287_v40, %s1657_s8 }
 0xde0   :  { %v1291_v41 = vpop.permute.xlu0 %1290 }
 0xde1   :  { %v1296_v42 = vsel %vm193_vm5, %v1833_v63, %v1291_v41 }
 0xde2   :  { %1298 = vst.msk [vmem:[#allocation2] sm:$0xff] %vm716_vm8, %v1296_v42 }
 0xde3   :  { %1641 = shalt.err (!%p1638_p4)
}
 0xde4   :  { %s1642_s8 = scalar_lea.hbm %s2001_s5, 256 }
 0xde5   :  { %p1643_p5 = scmp.ne.s32.totalorder %s2001_s5, %s1642_s8  ;;  %p1646_p6 = scmp.lt.u32.totalorder %s1642_s8, %s2001_s5 }
 0xde7   :  { %p1648_p7 = pnand %p1646_p6, %p1643_p5 }
 0xde9   :  { %1651 = shalt.err (!%p1648_p7)
}
 0xdea   :  { %s1660_s25 = smov 128  }
 0xdeb   :  { %1311 = dma.vmem_to_hbm [thread:$0]  %s1306_s17, 256, %s2001_s5, [#allocation3], %s1660_s25, %s1660_s25, %s1656_s24  }
 0xdec   :  { %1652 = dma.done.wait [#allocation3], 256  }
 0xded   :  { %1653 = vsyncadd [#allocation3], 4294967040 }
 0xdee   :  { %1315 = vsyncpa [#allocation3], 1 }

</bundles_post_ra>
